<compile_context>
chip_gen: v7x
topology: tpu7x:2x2x1
jax: 0.10.0
libtpu: 0.0.40
codegen_flags: <defaults>
</compile_context>

<pallas_src>
import jax
import jax.numpy as jnp
import numpy as np
from jax.experimental import pallas as pl
from jax.experimental.pallas import tpu as pltpu


_SUBLANE = 8
_TARGET_TB = 1024                      # batch-tile target (rows)
_VMEM_LIMIT = 32 * 1024 * 1024         # raise v5e's 16 MiB default; default on v6e/v7x


def _round_up(n, m):
    return ((n + m - 1) // m) * m


def _choose_tb(B, E):
    """Balanced batch tile: large enough to amortize the ~0.35us per-grid-step
    overhead, small enough to stay well inside scoped VMEM, and >= 2 grid steps
    once the batch is big enough that v7x 2-TensorCore sharding pays off."""
    b8 = _round_up(B, _SUBLANE)
    # Keep double-buffered f32 x + out tiles (4 * tb * E * 4 bytes) under ~12 MiB.
    cap = max(_SUBLANE, ((12 * 1024 * 1024) // (16 * E)) // _SUBLANE * _SUBLANE)
    target = min(_TARGET_TB, cap)
    if b8 <= target:
        if b8 >= 512 and target >= 256:
            return _round_up(pl.cdiv(B, 2), _SUBLANE)      # 2 balanced tiles (v7x)
        return b8                                          # single tile, small batch
    steps = max(2, pl.cdiv(B, target))
    return _round_up(pl.cdiv(B, steps), _SUBLANE)          # balanced tiles, no tiny tail


def actor_hidden_kernel(x_ref, w1_ref, b1_ref, w2_ref, b2_ref, o_ref):
    """tanh( tanh(x @ W1 + b1) @ W2 + b2 ) on one (tb, E) batch tile.

    Weights arrive in bf16 (MXU-native on v5e/v6e/v7x); x is loaded as f32 and
    cast in-kernel (VPU, hidden under DMA). Accumulation, bias add and tanh all
    stay in f32, so no bf16 VPU/EUP is required (v5e-safe epilogue).
    """
    w1 = w1_ref[...]
    w2 = w2_ref[...]
    x = x_ref[...].astype(w1.dtype)
    h = jnp.dot(x, w1, preferred_element_type=jnp.float32)
    h = jnp.tanh(h + b1_ref[...])                          # f32 epilogue
    o = jnp.dot(h.astype(w2.dtype), w2, preferred_element_type=jnp.float32)
    o_ref[...] = jnp.tanh(o + b2_ref[...]).astype(o_ref.dtype)


@jax.jit
def actor_hidden(x, w1, b1, w2, b2):
    B, E = x.shape
    E_w, H = w1.shape
    assert E_w == E and w2.shape == (H, E)
    assert b1.shape == (1, H) and b2.shape == (1, E)

    tb = _choose_tb(B, E)
    grid = (pl.cdiv(B, tb),)

    bytes_accessed = (
        x.size * x.dtype.itemsize
        + w1.size * w1.dtype.itemsize + w2.size * w2.dtype.itemsize
        + b1.size * b1.dtype.itemsize + b2.size * b2.dtype.itemsize
        + B * E * 4                                        # f32 output
    )
    cost = pl.CostEstimate(
        flops=2 * B * (E * H + H * E),
        transcendentals=B * (H + E),
        bytes_accessed=bytes_accessed,
    )

    return pl.pallas_call(
        actor_hidden_kernel,
        out_shape=jax.ShapeDtypeStruct((B, E), jnp.float32),
        grid_spec=pltpu.PrefetchScalarGridSpec(
            num_scalar_prefetch=0,
            grid=grid,
            in_specs=[
                pl.BlockSpec((tb, E), lambda i: (i, 0)),   # x tile (double-buffered)
                # weights/biases: constant index_map -> DMA'd once, VMEM-resident
                pl.BlockSpec((E, H), lambda i: (0, 0)),
                pl.BlockSpec((1, H), lambda i: (0, 0)),
                pl.BlockSpec((H, E), lambda i: (0, 0)),
                pl.BlockSpec((1, E), lambda i: (0, 0)),
            ],
            out_specs=pl.BlockSpec((tb, E), lambda i: (i, 0)),
        ),
        compiler_params=pltpu.CompilerParams(
            dimension_semantics=("parallel",),   # shard batch tiles across TCs (v7x)
            vmem_limit_bytes=_VMEM_LIMIT,
        ),
        cost_estimate=cost,
    )(x, w1, b1, w2, b2)


def orthogonal_init(key, shape, gain):
    # deterministic orthogonal init (matches nn.init.orthogonal_ semantics)
    rows, cols = shape
    n = max(rows, cols)
    a = jax.random.normal(key, (n, n), dtype=jnp.float32)
    q, r = jnp.linalg.qr(a)
    q = q * jnp.sign(jnp.diag(r))[None, :]
    return gain * q[:rows, :cols]


class TransformerBasePallas:
    """Pallas implementation of TransformerBase.forward with default flags
    (recurrent=False, flow_encoder=False)."""

    def __init__(self, embedding_size, hidden_size, key, compute_dtype=jnp.bfloat16):
        self.compute_dtype = compute_dtype

        gain = float(np.sqrt(2.0))
        k1, k2 = jax.random.split(key)
        # PyTorch Linear weight is (out, in); we store its transpose (in, out).
        w1_torch = orthogonal_init(k1, (hidden_size, embedding_size), gain)
        w2_torch = orthogonal_init(k2, (embedding_size, hidden_size), gain)

        # Master f32 parameters (used for the reference check).
        self.w1 = jnp.asarray(w1_torch.T)                      # (E, H)
        self.b1 = jnp.zeros((hidden_size,), jnp.float32)       # init constant 0
        self.w2 = jnp.asarray(w2_torch.T)                      # (H, E)
        self.b2 = jnp.zeros((embedding_size,), jnp.float32)

        # Compute-time copies, built once at init: bf16 weights (MXU inputs),
        # f32 biases reshaped to (1, dim) for the in-kernel broadcast.
        self.w1_c = self.w1.astype(compute_dtype)
        self.w2_c = self.w2.astype(compute_dtype)
        self.b1_c = self.b1.reshape(1, -1)
        self.b2_c = self.b2.reshape(1, -1)

    def forward(self, inputs, rnn_hxs, masks):
        # flow_enc=False, is_recurrent=False -> context_tensor = inputs; rnn_hxs untouched
        actor_features = actor_hidden(inputs, self.w1_c, self.b1_c,
                                      self.w2_c, self.b2_c)
        return actor_features, rnn_hxs


if __name__ == "__main__":
    key = jax.random.PRNGKey(0)
    k_in, k_params = jax.random.split(key)

    batch = 8
    embedding_size = 32
    hidden_size = 64

    model = TransformerBasePallas(embedding_size, hidden_size, k_params)

    inputs = jax.random.normal(k_in, (batch, embedding_size), dtype=jnp.float32)
    rnn_hxs = jnp.zeros((batch, 1), jnp.float32)   # recurrent_hidden_state_size == 1
    masks = jnp.ones((batch, 1), jnp.float32)

    actor_features, rnn_hxs_out = model.forward(inputs, rnn_hxs, masks)
    jax.block_until_ready(actor_features)
    jax.block_until_ready(rnn_hxs_out)

    # sanity check vs plain-JAX f32 reference
    ref = jnp.tanh(jnp.tanh(inputs @ model.w1 + model.b1) @ model.w2 + model.b2)
    np.testing.assert_allclose(np.asarray(actor_features), np.asarray(ref),
                               rtol=2e-2, atol=2e-2)   # bf16 MXU inputs
    assert actor_features.shape == (batch, embedding_size)
    assert actor_features.dtype == jnp.float32
    assert rnn_hxs_out.shape == rnn_hxs.shape

    print("KERNEL_OK")
</pallas_src>

<mosaic_0001>
module attributes {stable_mosaic.version = 11 : i64} {
  func.func @actor_hidden_kernel(%arg0: i32, %arg1: memref<8x32xf32, #tpu.memory_space<vmem>>, %arg2: memref<32x64xbf16, #tpu.memory_space<vmem>>, %arg3: memref<1x64xf32, #tpu.memory_space<vmem>>, %arg4: memref<64x32xbf16, #tpu.memory_space<vmem>>, %arg5: memref<1x32xf32, #tpu.memory_space<vmem>>, %arg6: memref<8x32xf32, #tpu.memory_space<vmem>>) attributes {dimension_semantics = [#tpu.dimension_semantics<parallel>], iteration_bounds = array<i64: 1>, scalar_prefetch = 0 : i64, scratch_operands = 0 : i64, tpu.core_type = #tpu.core_type<tc>, window_params = [{transform_indices = @transform_0, window_bounds = array<i64: 8, 32>}, {pipeline_mode = #tpu.pipeline_mode<synchronous>, transform_indices = @transform_1, window_bounds = array<i64: 32, 64>}, {pipeline_mode = #tpu.pipeline_mode<synchronous>, transform_indices = @transform_2, window_bounds = array<i64: 1, 64>}, {pipeline_mode = #tpu.pipeline_mode<synchronous>, transform_indices = @transform_3, window_bounds = array<i64: 64, 32>}, {pipeline_mode = #tpu.pipeline_mode<synchronous>, transform_indices = @transform_4, window_bounds = array<i64: 1, 32>}, {transform_indices = @transform_5, window_bounds = array<i64: 8, 32>}]} {
    %c0 = arith.constant 0 : index
    %c0_0 = arith.constant 0 : index
    %0 = vector.load %arg2[%c0, %c0_0] : memref<32x64xbf16, #tpu.memory_space<vmem>>, vector<32x64xbf16>
    %c0_1 = arith.constant 0 : index
    %c0_2 = arith.constant 0 : index
    %1 = vector.load %arg4[%c0_1, %c0_2] : memref<64x32xbf16, #tpu.memory_space<vmem>>, vector<64x32xbf16>
    %c0_3 = arith.constant 0 : index
    %c0_4 = arith.constant 0 : index
    %2 = vector.load %arg1[%c0_3, %c0_4] : memref<8x32xf32, #tpu.memory_space<vmem>>, vector<8x32xf32>
    %3 = arith.truncf %2 : vector<8x32xf32> to vector<8x32xbf16>
    %cst = arith.constant dense<0.000000e+00> : vector<8x64xf32>
    %4 = tpu.matmul %3, %0, %cst {dimension_numbers = #tpu.dot_dimension_numbers<[1], [0], [0], [1], [0, 0, 1, 1], [], []>} : vector<8x32xbf16>, vector<32x64xbf16>, vector<8x64xf32> -> vector<8x64xf32>
    %c0_5 = arith.constant 0 : index
    %c0_6 = arith.constant 0 : index
    %5 = vector.load %arg3[%c0_5, %c0_6] : memref<1x64xf32, #tpu.memory_space<vmem>>, vector<1x64xf32>
    %6 = vector.broadcast %5 : vector<1x64xf32> to vector<8x64xf32>
    %7 = arith.addf %4, %6 : vector<8x64xf32>
    %8 = math.tanh %7 : vector<8x64xf32>
    %9 = arith.truncf %8 : vector<8x64xf32> to vector<8x64xbf16>
    %cst_7 = arith.constant dense<0.000000e+00> : vector<8x32xf32>
    %10 = tpu.matmul %9, %1, %cst_7 {dimension_numbers = #tpu.dot_dimension_numbers<[1], [0], [0], [1], [0, 0, 1, 1], [], []>} : vector<8x64xbf16>, vector<64x32xbf16>, vector<8x32xf32> -> vector<8x32xf32>
    %c0_8 = arith.constant 0 : index
    %c0_9 = arith.constant 0 : index
    %11 = vector.load %arg5[%c0_8, %c0_9] : memref<1x32xf32, #tpu.memory_space<vmem>>, vector<1x32xf32>
    %12 = vector.broadcast %11 : vector<1x32xf32> to vector<8x32xf32>
    %13 = arith.addf %10, %12 : vector<8x32xf32>
    %14 = math.tanh %13 : vector<8x32xf32>
    %c0_10 = arith.constant 0 : index
    %c0_11 = arith.constant 0 : index
    %15 = vector.load %arg6[%c0_10, %c0_11] : memref<8x32xf32, #tpu.memory_space<vmem>>, vector<8x32xf32>
    tpu.vector_store %arg6[%c0_10, %c0_11], %14 {strides = array<i32>} : memref<8x32xf32, #tpu.memory_space<vmem>>, vector<8x32xf32>,
    return
  }
  func.func @transform_0(%arg0: i32) -> (i32, i32) {
    %c0_i32 = arith.constant 0 : i32
    %c0_i32_0 = arith.constant 0 : i32
    return %arg0, %c0_i32 : i32, i32
  }
  func.func @transform_1(%arg0: i32) -> (i32, i32) {
    %c0_i32 = arith.constant 0 : i32
    %c0_i32_0 = arith.constant 0 : i32
    %c0_i32_1 = arith.constant 0 : i32
    return %c0_i32, %c0_i32_0 : i32, i32
  }
  func.func @transform_2(%arg0: i32) -> (i32, i32) {
    %c0_i32 = arith.constant 0 : i32
    %c0_i32_0 = arith.constant 0 : i32
    %c0_i32_1 = arith.constant 0 : i32
    return %c0_i32, %c0_i32_0 : i32, i32
  }
  func.func @transform_3(%arg0: i32) -> (i32, i32) {
    %c0_i32 = arith.constant 0 : i32
    %c0_i32_0 = arith.constant 0 : i32
    %c0_i32_1 = arith.constant 0 : i32
    return %c0_i32, %c0_i32_0 : i32, i32
  }
  func.func @transform_4(%arg0: i32) -> (i32, i32) {
    %c0_i32 = arith.constant 0 : i32
    %c0_i32_0 = arith.constant 0 : i32
    %c0_i32_1 = arith.constant 0 : i32
    return %c0_i32, %c0_i32_0 : i32, i32
  }
  func.func @transform_5(%arg0: i32) -> (i32, i32) {
    %c0_i32 = arith.constant 0 : i32
    %c0_i32_0 = arith.constant 0 : i32
    return %arg0, %c0_i32 : i32, i32
  }
}

</mosaic_0001>

<bundles_post_ra>
// kernel: actor_hidden.1
= control target key start
LH: loop header
LB: loop body
LE: loop exit
PB: predicated region body
PF: predicated region fallthrough
CT: control target
= control target key end

     0   :  { %v267_v1 = vmov 0.0   ;;  %vm268_vm0 = vmmov 0   ;;  %s341_s0 = inlined_call_operand.vmem [shape: f32[8,32], index: 0, kind: input, shape index: {}]   ;;  %s342_s1 = inlined_call_operand.vmem [shape: bf16[32,64], index: 1, kind: input, shape index: {}]   ;;  %s343_s2 = inlined_call_operand.vmem [shape: f32[1,64], index: 2, kind: input, shape index: {}]   ;;  %s344_s3 = inlined_call_operand.vmem [shape: bf16[64,32], index: 3, kind: input, shape index: {}]   ;;  %s345_s4 = inlined_call_operand.vmem [shape: f32[1,32], index: 4, kind: input, shape index: {}]   ;;  %s346_s5 = inlined_call_operand.hbm [shape: f32[8,32], index: 5, kind: output, shape index: {}]  }
   0x1   :  { %v233_v0 = vld [vmem:[%s342_s1] sm:$0xff]   ;;  %210 = vmatprep.subr.bf16.mxu0 %v267_v1  ;;  %218 = vmatprep.subr.bf16.mxu1 %v267_v1  ;;  %v234_v2 = vld [vmem:[%s342_s1 + $0x8] sm:$0xff]  }
   0x2   :  { %211 = vmatpush3.bf16.msra.mxu0 %v233_v0  ;;  %214 = vmatprep.mubr.msk.bf16.mxu0 %vm268_vm0, %v267_v1  ;;  %v34_v3 = vld [vmem:[%s341_s0] sm:$0xff] }
   0x3   :  { %212 = vmatprep.subr.bf16.mxu0 %v267_v1  ;;  %226 = vmatprep.mubr.msk.bf16.mxu1 %vm268_vm0, %v267_v1  ;;  %v35_v4 = vpack.c.bf16 %v34_v3, %v34_v3 }
   0x4   :  { %10 = vsyncpa [#allocation3], 0  ;;  %vm55_vm1 = vcmask 261120   ;;  %v235_v5 = vld [vmem:[%s344_s3] sm:$0xff]   ;;  %v236_v6 = vld [vmem:[%s344_s3 + $0x8] sm:$0xff]   ;;  %vm132_vm2 = vcmask 523264  }
   0x5   :  { %219 = vmatpush3.bf16.msra.mxu1 %v235_v5  ;;  %v237_v7 = vld [vmem:[%s344_s3 + $0x10] sm:$0xff]   ;;  %v238_v8 = vld [vmem:[%s344_s3 + $0x18] sm:$0xff]   ;;  %v192_v9 = vld [vmem:[%s343_s2] ss:$0 sm:$0xff]  ;;  %s269_s2 = smov [#allocation2]  }
   0x6   :  { %213 = vmatpush3.bf16.msra.mxu0 %v234_v2  ;;  %220 = vmatprep.subr.bf16.mxu1 %v267_v1  ;;  %v196_v17 = vld [vmem:[%s345_s4] ss:$0 sm:$0xff]  ;;  %s184_s3 = sshll.u32 %s269_s2, 4  ;;  %s185_s3 = int_to_ptr.vmem [resolvable:$true] %s184_s3 }
   0x7   :  { %s243_s9 = scalar_lea.vmem %s185_s3, 128  ;;  %p248_p1 = scmp.lt.s32.totalorder %s185_s3, %s185_s3 }
   0x8   :  { %p244_p0 = scmp.ne.s32.totalorder %s185_s3, %s243_s9  ;;  %p249_p2 = scmp.lt.s32.totalorder %s243_s9, %s243_s9 }
   0x9   :  { %215 = vmatmul.mubr.msk.bf16.vlgmr.msra.gmra.mrb[0].mxu0 %vm55_vm1, %v35_v4  ;;  %221 = vmatpush3.bf16.msra.mxu1 %v236_v6 }
   0xa   :  { %222 = vmatprep.subr.bf16.mxu1 %v267_v1  ;;  %p250_p3 = por %p249_p2, %p248_p1 }
   0xc   :  { %p251_p4 = pnand %p250_p3, %p244_p0 }
   0xd   :  { %223 = vmatpush3.bf16.msra.mxu1 %v237_v7 }
   0xe   :  { %224 = vmatprep.subr.bf16.mxu1 %v267_v1 }
  0x11   :  { %225 = vmatpush3.bf16.msra.mxu1 %v238_v8 }
  0xdc   :  { %v93_v10 = vpop.f32.mrb[0].mxu0 }
  0xdd   :  { %v94_v11 = vadd.f32 %v192_v9, %v93_v10  ;;  %v216_v12 = vpop.f32.mrb[1].mxu0 }
  0xde   :  { %v96_v13 = vpop.f32.mrb[2].mxu0 }
  0xdf   :  { %239 = vtanh.f32 %v94_v11  ;;  %v217_v14 = vpop.f32.mrb[3].mxu0 }
  0xe9   :  { %v240_v15 = vpop.eup %239 }
  0xea   :  { %v100_v16 = vpack.c.bf16 %v240_v15, %v240_v15 }
  0xec   :  { %227 = vmatmul.mubr.msk.bf16.vlgmr.msra.gmra.mrb[0].mxu1 %vm132_vm2, %v100_v16 }
 0x1bf   :  { %v170_v18 = vpop.f32.mrb[0].mxu1 }
 0x1c0   :  { %v171_v19 = vadd.f32 %v196_v17, %v170_v18  ;;  %v228_v20 = vpop.f32.mrb[1].mxu1 }
 0x1c1   :  { %v173_v21 = vpop.f32.mrb[2].mxu1 }
 0x1c2   :  { %241 = vtanh.f32 %v171_v19  ;;  %v229_v22 = vpop.f32.mrb[3].mxu1 }
 0x1cc   :  { %v242_v23 = vpop.eup %241 }
 0x1cd   :  { %177 = vst.msk [vmem:[#allocation2] sm:$0xff] %vm55_vm1, %v242_v23 }
 0x1ce   :  { %254 = shalt.err (!%p251_p4)
}
 0x1cf   :  { %s255_s11 = scalar_lea.hbm %s346_s5, 128 }
 0x1d0   :  { %p256_p5 = scmp.ne.s32.totalorder %s346_s5, %s255_s11  ;;  %p259_p6 = scmp.lt.u32.totalorder %s255_s11, %s346_s5 }
 0x1d2   :  { %p261_p7 = pnand %p259_p6, %p256_p5 }
 0x1d4   :  { %264 = shalt.err (!%p261_p7)
}
 0x1d5   :  { %187 = dma.vmem_to_hbm [thread:$0]  %s185_s3, 128, %s346_s5, [#allocation3]  }
 0x1d6   :  { %265 = dma.done.wait [#allocation3], 128  }
 0x1d7   :  { %266 = vsyncadd [#allocation3], 4294967168 }
 0x1d8   :  { %191 = vsyncpa [#allocation3], 1 }

</bundles_post_ra>
